<compile_context>
chip_gen: v6e
topology: v6e:2x2x1
jax: 0.10.0
libtpu: 0.0.40
codegen_flags: <defaults>
</compile_context>

<pallas_src>
import jax
import jax.numpy as jnp
from jax.experimental import pallas as pl
from jax.experimental.pallas import tpu as pltpu

IN_F, H1, H2, OUT_F = 325, 256, 64, 1
TILE_B_MAX = 4096                      # batch rows per grid step
VMEM_LIMIT_BYTES = 48 * 1024 * 1024    # headroom for 4096-row tiles (< v7x 64 MiB)


def mlp_kernel(x_ref, w1_ref, b1_ref, w2_ref, b2_ref, w3_ref, b3_ref, o_ref):
    """One (tile_b, 325) batch tile -> (tile_b, 1) tanh values, fully fused."""
    # bf16 operands on the MXU (native rate), f32 accumulation, f32 epilogue.
    x = x_ref[...].astype(jnp.bfloat16)

    h1 = jnp.dot(x, w1_ref[...], preferred_element_type=jnp.float32) + b1_ref[...]
    h1 = jnp.maximum(h1, 0.0)

    h2 = jnp.dot(h1.astype(jnp.bfloat16), w2_ref[...],
                 preferred_element_type=jnp.float32) + b2_ref[...]
    h2 = jnp.maximum(h2, 0.0)

    # Value head (64 -> 1) on VPU/XLU instead of a 1-column MXU matmul.
    logit = jnp.sum(h2 * w3_ref[...], axis=-1, keepdims=True) + b3_ref[...]
    o_ref[...] = jnp.tanh(logit)


def _round_up(n, m):
    return ((n + m - 1) // m) * m


def _pick_tile(b):
    """Balanced, 8-aligned batch tile; >= 2 grid steps for B >= 256 (v7x TCs)."""
    num_tiles = pl.cdiv(b, TILE_B_MAX)
    if b >= 256:
        num_tiles = max(num_tiles, 2)
    if num_tiles == 1:
        return b  # single full-extent block; any B is a legal block dim
    return min(TILE_B_MAX, _round_up(pl.cdiv(b, num_tiles), 8))


@jax.jit
def value_func_forward(x, params):
    """x: (B, 325) f32 -> (B, 1) f32 == tanh(value_head(relu(fc2(relu(fc1(x))))))."""
    w1, b1, w2, b2, w3, b3 = params
    B = x.shape[0]
    tile_b = _pick_tile(B)
    grid = (pl.cdiv(B, tile_b),)   # ragged tail handled by boundary-block masking

    # Advisory cost estimate (helps XLA schedule around the custom call).
    flops = 2 * B * (IN_F * H1 + H1 * H2 + H2 * OUT_F)
    bytes_accessed = (B * IN_F * 4 + B * OUT_F * 4
                      + 2 * (IN_F * H1 + H1 * H2)       # bf16 weights
                      + 4 * (H1 + H2 + H2 + OUT_F))     # f32 biases + value-head row
    cost = pl.CostEstimate(flops=flops, transcendentals=B,
                           bytes_accessed=bytes_accessed)

    # Weights/biases: whole-array blocks with constant index maps -> stay
    # resident in VMEM across all grid steps (no re-DMA per tile).
    const = lambda i: (0, 0)
    out = pl.pallas_call(
        mlp_kernel,
        out_shape=jax.ShapeDtypeStruct((B, OUT_F), jnp.float32),
        grid=grid,
        in_specs=[
            pl.BlockSpec((tile_b, IN_F), lambda i: (i, 0)),   # x: streamed
            pl.BlockSpec((IN_F, H1), const),                  # w1 (bf16, resident)
            pl.BlockSpec((1, H1), const),                     # b1 (f32)
            pl.BlockSpec((H1, H2), const),                    # w2 (bf16)
            pl.BlockSpec((1, H2), const),                     # b2 (f32)
            pl.BlockSpec((1, H2), const),                     # w3 row (f32)
            pl.BlockSpec((1, OUT_F), const),                  # b3 (f32)
        ],
        out_specs=pl.BlockSpec((tile_b, OUT_F), lambda i: (i, 0)),
        compiler_params=pltpu.CompilerParams(
            dimension_semantics=("parallel",),
            vmem_limit_bytes=VMEM_LIMIT_BYTES,
        ),
        cost_estimate=cost,
    )(x, w1, b1, w2, b2, w3, b3)
    return out


def init_params(key):
    """nn.Linear-style init: U(-1/sqrt(fan_in), 1/sqrt(fan_in)).

    w1/w2 stored as bf16 (in, out); value-head weight stored as f32 (1, 64) row.
    """
    def linear(key, fan_in, fan_out):
        kw, kb = jax.random.split(key)
        bound = 1.0 / jnp.sqrt(jnp.float32(fan_in))
        w = jax.random.uniform(kw, (fan_in, fan_out), jnp.float32, -bound, bound)
        b = jax.random.uniform(kb, (1, fan_out), jnp.float32, -bound, bound)
        return w, b

    k1, k2, k3 = jax.random.split(key, 3)
    w1, b1 = linear(k1, IN_F, H1)
    w2, b2 = linear(k2, H1, H2)
    w3, b3 = linear(k3, H2, OUT_F)
    return (w1.astype(jnp.bfloat16), b1,
            w2.astype(jnp.bfloat16), b2,
            w3.T.astype(jnp.float32), b3)   # w3 as (1, 64) row vector


def reference_forward_bf16(x, params):
    """Matches the kernel's numerics (bf16 dot inputs, f32 accumulation)."""
    w1, b1, w2, b2, w3, b3 = params
    h1 = jnp.maximum(
        jnp.dot(x.astype(jnp.bfloat16), w1, preferred_element_type=jnp.float32) + b1, 0.0)
    h2 = jnp.maximum(
        jnp.dot(h1.astype(jnp.bfloat16), w2, preferred_element_type=jnp.float32) + b2, 0.0)
    return jnp.tanh(jnp.sum(h2 * w3, axis=-1, keepdims=True) + b3)


def reference_forward_f32(x, params):
    """Pure-f32 semantic check of the original module."""
    w1, b1, w2, b2, w3, b3 = params
    h1 = jnp.maximum(x @ w1.astype(jnp.float32) + b1, 0.0)
    h2 = jnp.maximum(h1 @ w2.astype(jnp.float32) + b2, 0.0)
    return jnp.tanh(jnp.sum(h2 * w3, axis=-1, keepdims=True) + b3)


if __name__ == "__main__":
    key = jax.random.PRNGKey(0)
    k_params, k_x1, k_x2 = jax.random.split(key, 3)

    params = init_params(k_params)

    # Small batch (single full-extent block, no raggedness).
    B = 8
    x = jax.random.normal(k_x1, (B, IN_F), dtype=jnp.float32)
    out = jax.block_until_ready(value_func_forward(x, params))
    assert out.shape == (B, 1), out.shape
    assert jnp.allclose(out, reference_forward_bf16(x, params), atol=5e-3, rtol=5e-3)
    assert jnp.allclose(out, reference_forward_f32(x, params), atol=5e-2, rtol=5e-2)

    # Ragged batch >= 256: exercises the 2-step grid + masked boundary block.
    B2 = 300
    x2 = jax.random.normal(k_x2, (B2, IN_F), dtype=jnp.float32)
    out2 = jax.block_until_ready(value_func_forward(x2, params))
    assert out2.shape == (B2, 1), out2.shape
    assert jnp.allclose(out2, reference_forward_bf16(x2, params), atol=5e-3, rtol=5e-3)
    assert jnp.allclose(out2, reference_forward_f32(x2, params), atol=5e-2, rtol=5e-2)

    print("KERNEL_OK")
</pallas_src>

<mosaic_0001>
module attributes {stable_mosaic.version = 11 : i64} {
  func.func @mlp_kernel(%arg0: i32, %arg1: memref<8x325xf32, #tpu.memory_space<vmem>>, %arg2: memref<325x256xbf16, #tpu.memory_space<vmem>>, %arg3: memref<1x256xf32, #tpu.memory_space<vmem>>, %arg4: memref<256x64xbf16, #tpu.memory_space<vmem>>, %arg5: memref<1x64xf32, #tpu.memory_space<vmem>>, %arg6: memref<1x64xf32, #tpu.memory_space<vmem>>, %arg7: memref<1x1xf32, #tpu.memory_space<vmem>>, %arg8: memref<8x1xf32, #tpu.memory_space<vmem>>) attributes {dimension_semantics = [#tpu.dimension_semantics<parallel>], iteration_bounds = array<i64: 1>, scalar_prefetch = 0 : i64, scratch_operands = 0 : i64, tpu.core_type = #tpu.core_type<tc>, window_params = [{transform_indices = @transform_0, window_bounds = array<i64: 8, 325>}, {pipeline_mode = #tpu.pipeline_mode<synchronous>, transform_indices = @transform_1, window_bounds = array<i64: 325, 256>}, {pipeline_mode = #tpu.pipeline_mode<synchronous>, transform_indices = @transform_2, window_bounds = array<i64: 1, 256>}, {pipeline_mode = #tpu.pipeline_mode<synchronous>, transform_indices = @transform_3, window_bounds = array<i64: 256, 64>}, {pipeline_mode = #tpu.pipeline_mode<synchronous>, transform_indices = @transform_4, window_bounds = array<i64: 1, 64>}, {pipeline_mode = #tpu.pipeline_mode<synchronous>, transform_indices = @transform_5, window_bounds = array<i64: 1, 64>}, {pipeline_mode = #tpu.pipeline_mode<synchronous>, transform_indices = @transform_6, window_bounds = array<i64: 1, 1>}, {transform_indices = @transform_7, window_bounds = array<i64: 8, 1>}]} {
    %c0 = arith.constant 0 : index
    %c0_0 = arith.constant 0 : index
    %0 = vector.load %arg1[%c0, %c0_0] : memref<8x325xf32, #tpu.memory_space<vmem>>, vector<8x325xf32>
    %1 = arith.truncf %0 : vector<8x325xf32> to vector<8x325xbf16>
    %c0_1 = arith.constant 0 : index
    %c0_2 = arith.constant 0 : index
    %2 = vector.load %arg2[%c0_1, %c0_2] : memref<325x256xbf16, #tpu.memory_space<vmem>>, vector<325x256xbf16>
    %cst = arith.constant dense<0.000000e+00> : vector<8x256xf32>
    %3 = tpu.matmul %1, %2, %cst {dimension_numbers = #tpu.dot_dimension_numbers<[1], [0], [0], [1], [0, 0, 1, 1], [], []>} : vector<8x325xbf16>, vector<325x256xbf16>, vector<8x256xf32> -> vector<8x256xf32>
    %c0_3 = arith.constant 0 : index
    %c0_4 = arith.constant 0 : index
    %4 = vector.load %arg3[%c0_3, %c0_4] : memref<1x256xf32, #tpu.memory_space<vmem>>, vector<1x256xf32>
    %5 = vector.broadcast %4 : vector<1x256xf32> to vector<8x256xf32>
    %6 = arith.addf %3, %5 : vector<8x256xf32>
    %cst_5 = arith.constant 0.000000e+00 : f32
    %7 = vector.broadcast %cst_5 : f32 to vector<8x256xf32>
    %8 = arith.maximumf %6, %7 : vector<8x256xf32>
    %9 = arith.truncf %8 : vector<8x256xf32> to vector<8x256xbf16>
    %c0_6 = arith.constant 0 : index
    %c0_7 = arith.constant 0 : index
    %10 = vector.load %arg4[%c0_6, %c0_7] : memref<256x64xbf16, #tpu.memory_space<vmem>>, vector<256x64xbf16>
    %cst_8 = arith.constant dense<0.000000e+00> : vector<8x64xf32>
    %11 = tpu.matmul %9, %10, %cst_8 {dimension_numbers = #tpu.dot_dimension_numbers<[1], [0], [0], [1], [0, 0, 1, 1], [], []>} : vector<8x256xbf16>, vector<256x64xbf16>, vector<8x64xf32> -> vector<8x64xf32>
    %c0_9 = arith.constant 0 : index
    %c0_10 = arith.constant 0 : index
    %12 = vector.load %arg5[%c0_9, %c0_10] : memref<1x64xf32, #tpu.memory_space<vmem>>, vector<1x64xf32>
    %13 = vector.broadcast %12 : vector<1x64xf32> to vector<8x64xf32>
    %14 = arith.addf %11, %13 : vector<8x64xf32>
    %cst_11 = arith.constant 0.000000e+00 : f32
    %15 = vector.broadcast %cst_11 : f32 to vector<8x64xf32>
    %16 = arith.maximumf %14, %15 : vector<8x64xf32>
    %c0_12 = arith.constant 0 : index
    %c0_13 = arith.constant 0 : index
    %17 = vector.load %arg6[%c0_12, %c0_13] : memref<1x64xf32, #tpu.memory_space<vmem>>, vector<1x64xf32>
    %18 = vector.broadcast %17 : vector<1x64xf32> to vector<8x64xf32>
    %19 = arith.mulf %16, %18 : vector<8x64xf32>
    %cst_14 = arith.constant dense<0.000000e+00> : vector<8xf32>
    %20 = vector.multi_reduction <add>, %19, %cst_14 [1] : vector<8x64xf32> to vector<8xf32>
    %21 = vector.shape_cast %20 : vector<8xf32> to vector<8x1xf32>
    %c0_15 = arith.constant 0 : index
    %c0_16 = arith.constant 0 : index
    %22 = vector.load %arg7[%c0_15, %c0_16] : memref<1x1xf32, #tpu.memory_space<vmem>>, vector<1x1xf32>
    %23 = vector.broadcast %22 : vector<1x1xf32> to vector<8x1xf32>
    %24 = arith.addf %21, %23 : vector<8x1xf32>
    %25 = math.tanh %24 : vector<8x1xf32>
    %c0_17 = arith.constant 0 : index
    %c0_18 = arith.constant 0 : index
    %26 = vector.load %arg8[%c0_17, %c0_18] : memref<8x1xf32, #tpu.memory_space<vmem>>, vector<8x1xf32>
    tpu.vector_store %arg8[%c0_17, %c0_18], %25 {strides = array<i32>} : memref<8x1xf32, #tpu.memory_space<vmem>>, vector<8x1xf32>,
    return
  }
  func.func @transform_0(%arg0: i32) -> (i32, i32) {
    %c0_i32 = arith.constant 0 : i32
    %c0_i32_0 = arith.constant 0 : i32
    return %arg0, %c0_i32 : i32, i32
  }
  func.func @transform_1(%arg0: i32) -> (i32, i32) {
    %c0_i32 = arith.constant 0 : i32
    %c0_i32_0 = arith.constant 0 : i32
    %c0_i32_1 = arith.constant 0 : i32
    return %c0_i32, %c0_i32_0 : i32, i32
  }
  func.func @transform_2(%arg0: i32) -> (i32, i32) {
    %c0_i32 = arith.constant 0 : i32
    %c0_i32_0 = arith.constant 0 : i32
    %c0_i32_1 = arith.constant 0 : i32
    return %c0_i32, %c0_i32_0 : i32, i32
  }
  func.func @transform_3(%arg0: i32) -> (i32, i32) {
    %c0_i32 = arith.constant 0 : i32
    %c0_i32_0 = arith.constant 0 : i32
    %c0_i32_1 = arith.constant 0 : i32
    return %c0_i32, %c0_i32_0 : i32, i32
  }
  func.func @transform_4(%arg0: i32) -> (i32, i32) {
    %c0_i32 = arith.constant 0 : i32
    %c0_i32_0 = arith.constant 0 : i32
    %c0_i32_1 = arith.constant 0 : i32
    return %c0_i32, %c0_i32_0 : i32, i32
  }
  func.func @transform_5(%arg0: i32) -> (i32, i32) {
    %c0_i32 = arith.constant 0 : i32
    %c0_i32_0 = arith.constant 0 : i32
    %c0_i32_1 = arith.constant 0 : i32
    return %c0_i32, %c0_i32_0 : i32, i32
  }
  func.func @transform_6(%arg0: i32) -> (i32, i32) {
    %c0_i32 = arith.constant 0 : i32
    %c0_i32_0 = arith.constant 0 : i32
    %c0_i32_1 = arith.constant 0 : i32
    return %c0_i32, %c0_i32_0 : i32, i32
  }
  func.func @transform_7(%arg0: i32) -> (i32, i32) {
    %c0_i32 = arith.constant 0 : i32
    %c0_i32_0 = arith.constant 0 : i32
    return %arg0, %c0_i32 : i32, i32
  }
}

</mosaic_0001>

<bundles_post_ra>
// kernel: value_func_forward.1
= control target key start
LH: loop header
LB: loop body
LE: loop exit
PB: predicated region body
PF: predicated region fallthrough
CT: control target
= control target key end

     0   :  { %s922_s0 = inlined_call_operand.vmem [shape: f32[8,325], index: 0, kind: input, shape index: {}]   ;;  %s923_s1 = inlined_call_operand.hbm [shape: bf16[325,256], index: 1, kind: input, shape index: {}]   ;;  %s924_s2 = inlined_call_operand.vmem [shape: f32[1,256], index: 2, kind: input, shape index: {}]   ;;  %s925_s3 = inlined_call_operand.vmem [shape: bf16[256,64], index: 3, kind: input, shape index: {}]   ;;  %s926_s4 = inlined_call_operand.vmem [shape: f32[1,64], index: 4, kind: input, shape index: {}]   ;;  %s927_s5 = inlined_call_operand.vmem [shape: f32[1,64], index: 5, kind: input, shape index: {}]   ;;  %s928_s6 = inlined_call_operand.<no memory space> [shape: f32[1,1], index: 6, kind: input, shape index: {}]   ;;  %s929_s7 = inlined_call_operand.vmem [shape: f32[8,1], index: 7, kind: output, shape index: {}]  }
   0x1   :  { %v12_v0 = vstv %s928_s6 }
   0x2   :  { %13 = vst [vmem:[#allocation2] sm:$0x1] %v12_v0 }
   0x3   :  { %14 = vsyncpa [#allocation4], 0  ;;  %s802_s26 = smov [#allocation3]  }
   0x4   :  { %s22_s27 = sshll.u32 %s802_s26, 4  ;;  %s23_s27 = int_to_ptr.vmem [resolvable:$true] %s22_s27 }
   0x5   :  { %s788_s28 = scalar_lea.vmem %s23_s27, 5248  ;;  %p793_p1 = scmp.lt.s32.totalorder %s23_s27, %s23_s27 }
   0x6   :  { %p789_p0 = scmp.ne.s32.totalorder %s23_s27, %s788_s28  ;;  %p794_p2 = scmp.lt.s32.totalorder %s788_s28, %s788_s28 }
   0x8   :  { %p795_p3 = por %p794_p2, %p793_p1 }
   0xa   :  { %p796_p4 = pnand %p795_p3, %p789_p0 }
   0xc   :  { %799 = shalt.err (!%p796_p4)
}
   0xd   :  { %s803_s29 = smov 128   ;;  %s804_s30 = smov 8  }
   0xe   :  { %28 = dma.hbm_to_vmem [thread:$0]  %s923_s1, 5248, %s23_s27, [#allocation4], %s803_s29, %s803_s29, %s804_s30  }
   0xf   :  { %800 = dma.done.wait [#allocation4], 5248  }
  0x10   :  { %801 = vsyncadd [#allocation4], 4294962048  ;;  %v805_v1 = vmov 0   ;;  %v700_v2 = vld [vmem:[#allocation3 + $0x74] ss:$8 sps:$4 sm:$0xff]   ;;  %vm311_vm0 = vcmask 1041408  }
  0x11   :  { %394 = vmatprep.mubr.bf16.mxu1 %v805_v1  ;;  %v702_v3 = vld [vmem:[#allocation3 + $0x70] ss:$8 sps:$4 sm:$0xff]   ;;  %321 = vmatprep.subr.bf16.mxu0 %v700_v2  ;;  %v703_v4 = vld [vmem:[#allocation3 + $0x64] ss:$8 sps:$4 sm:$0xff]   ;;  %v705_v5 = vld [vmem:[#allocation3 + $0x60] ss:$8 sps:$4 sm:$0xff]  }
  0x12   :  { %322 = vmatpush1.bf16.msra.mxu0 %v702_v3  ;;  %v706_v6 = vld [vmem:[#allocation3 + $0x54] ss:$8 sps:$4 sm:$0xff]   ;;  %v708_v7 = vld [vmem:[#allocation3 + $0x50] ss:$8 sps:$4 sm:$0xff]   ;;  %v709_v8 = vld [vmem:[#allocation3 + $0x44] ss:$8 sps:$4 sm:$0xff]  }
  0x13   :  { %323 = vmatprep.subr.bf16.mxu0 %v703_v4  ;;  %v711_v9 = vld [vmem:[#allocation3 + $0x40] ss:$8 sps:$4 sm:$0xff]   ;;  %vm312_vm1 = vcmask 1042432   ;;  %v806_v10 = vmov 65535   ;;  %v712_v12 = vld [vmem:[#allocation3 + $0x34] ss:$8 sps:$4 sm:$0xff]  }
  0x14   :  { %v313_v11 = vsel %vm311_vm0, 4294967295, %v806_v10  ;;  %v89_v13 = vld [vmem:[#allocation3 + $0x140] sm:$0x77]  ;;  %v714_v15 = vld [vmem:[#allocation3 + $0x30] ss:$8 sps:$4 sm:$0xff]   ;;  %v44_v32 = vld [vmem:[%s922_s0 + $0x8] sm:$0xff] }
  0x15   :  { %v314_v14 = vsel %vm312_vm1, %v313_v11, 0  ;;  %v652_v16 = vcombine.high %v89_v13, %v89_v13  ;;  %v651_v17 = vcombine.low %v89_v13, %v89_v13  ;;  %v715_v18 = vld [vmem:[#allocation3 + $0x24] ss:$8 sps:$4 sm:$0xff]   ;;  %v737_v21 = vld [vmem:[#allocation3 + $0x134] ss:$8 sps:$4 sm:$0xff]   ;;  %v47_v34 = vpack.c.bf16 %v44_v32, %v44_v32 }
  0x16   :  { %324 = vmatpush1.bf16.msra.mxu0 %v705_v5  ;;  %v717_v22 = vld [vmem:[#allocation3 + $0x20] ss:$8 sps:$4 sm:$0xff]   ;;  %v718_v23 = vld [vmem:[#allocation3 + $0x14] ss:$8 sps:$4 sm:$0xff]   ;;  %v740_v24 = vld [vmem:[#allocation3 + $0x130] ss:$8 sps:$4 sm:$0xff]  }
  0x17   :  { %325 = vmatprep.subr.bf16.mxu0 %v706_v6  ;;  %v319_v19 = vand.u32 %v652_v16, %v314_v14  ;;  %v316_v20 = vand.u32 %v651_v17, %v314_v14  ;;  %v743_v25 = vld [vmem:[#allocation3 + $0x124] ss:$8 sps:$4 sm:$0xff]   ;;  %v720_v26 = vld [vmem:[#allocation3 + $0x10] ss:$8 sps:$4 sm:$0xff]   ;;  %v746_v28 = vld [vmem:[#allocation3 + $0x120] ss:$8 sps:$4 sm:$0xff]   ;;  %353 = vmatprep.mubr.bf16.mxu0 %v47_v34 }
  0x18   :  { %v721_v27 = vld [vmem:[#allocation3 + $0x4] ss:$8 sps:$4 sm:$0xff]   ;;  %v749_v29 = vld [vmem:[#allocation3 + $0x114] ss:$8 sps:$4 sm:$0xff]   ;;  %v723_v30 = vld [vmem:[#allocation3] ss:$8 sps:$4 sm:$0xff]  }
  0x19   :  { %368 = vmatprep.subr.bf16.mxu1 %v319_v19  ;;  %v724_v31 = vld [vmem:[#allocation3 + $0xf4] ss:$8 sps:$4 sm:$0xff]   ;;  %v752_v33 = vld [vmem:[#allocation3 + $0x110] ss:$8 sps:$4 sm:$0xff]   ;;  %v755_v36 = vld [vmem:[#allocation3 + $0x104] ss:$8 sps:$4 sm:$0xff]  }
  0x1a   :  { %326 = vmatpush1.bf16.msra.mxu0 %v708_v7  ;;  %369 = vmatpush1.bf16.msra.mxu1 %v316_v20  ;;  %v726_v35 = vld [vmem:[#allocation3 + $0xf0] ss:$8 sps:$4 sm:$0xff]   ;;  %v727_v37 = vld [vmem:[#allocation3 + $0xe4] ss:$8 sps:$4 sm:$0xff]   ;;  %v758_v38 = vld [vmem:[#allocation3 + $0x100] ss:$8 sps:$4 sm:$0xff]  }
  0x1b   :  { %327 = vmatprep.subr.bf16.mxu0 %v709_v8  ;;  %370 = vmatprep.subr.bf16.mxu1 %v737_v21  ;;  %v45_v39 = vld [vmem:[%s922_s0 + $0x10] sm:$0xff]  ;;  %v729_v40 = vld [vmem:[#allocation3 + $0xe0] ss:$8 sps:$4 sm:$0xff]   ;;  %v762_v41 = vld [vmem:[%s925_s3 + $0x78] sm:$0xff]   ;;  %vm307_vm2 = vcmask 564224   ;;  %vm591_vm3 = vcmask 523264  }
  0x1c   :  { %v730_v42 = vld [vmem:[#allocation3 + $0xd4] ss:$8 sps:$4 sm:$0xff]   ;;  %v48_v44 = vpack.c.bf16 %v45_v39, %v45_v39  ;;  %v733_v46 = vld [vmem:[#allocation3 + $0xd0] ss:$8 sps:$4 sm:$0xff]   ;;  %v735_v47 = vld [vmem:[#allocation3 + $0xc4] ss:$8 sps:$4 sm:$0xff]  }
  0x1d   :  { %v763_v43 = vld [vmem:[%s925_s3 + $0x38] sm:$0xff]   ;;  %v764_v45 = vld [vmem:[%s925_s3 + $0x70] sm:$0xff]   ;;  %v766_v49 = vld [vmem:[%s925_s3 + $0x68] sm:$0xff]   ;;  %vm604_vm4 = vcmask 7168  }
  0x1e   :  { %328 = vmatpush1.bf16.msra.mxu0 %v711_v9  ;;  %371 = vmatpush1.bf16.msra.mxu1 %v740_v24  ;;  %v765_v48 = vld [vmem:[%s925_s3 + $0x30] sm:$0xff]   ;;  %v739_v50 = vld [vmem:[#allocation3 + $0xc0] ss:$8 sps:$4 sm:$0xff]   ;;  %v770_v0 = vld [vmem:[%s925_s3 + $0x58] sm:$0xff]  }
  0x1f   :  { %329 = vmatprep.subr.bf16.mxu0 %v712_v12  ;;  %372 = vmatprep.subr.bf16.mxu1 %v743_v25  ;;  %v741_v51 = vld [vmem:[#allocation3 + $0xb4] ss:$8 sps:$4 sm:$0xff]   ;;  %v767_v52 = vld [vmem:[%s925_s3 + $0x28] sm:$0xff]   ;;  %v745_v54 = vld [vmem:[#allocation3 + $0xb0] ss:$8 sps:$4 sm:$0xff]   ;;  %v92_v12 = vlaneseq }
  0x20   :  { %v768_v53 = vld [vmem:[%s925_s3 + $0x60] sm:$0xff]   ;;  %v757_v59 = vld [vmem:[#allocation3 + $0x90] ss:$8 sps:$4 sm:$0xff]   ;;  %v774_v4 = vld [vmem:[%s925_s3 + $0x48] sm:$0xff]  }
  0x21   :  { %v747_v55 = vld [vmem:[#allocation3 + $0xa4] ss:$8 sps:$4 sm:$0xff]   ;;  %v751_v57 = vld [vmem:[#allocation3 + $0xa0] ss:$8 sps:$4 sm:$0xff]   ;;  %v753_v58 = vld [vmem:[#allocation3 + $0x94] ss:$8 sps:$4 sm:$0xff]  }
  0x22   :  { %330 = vmatpush1.bf16.msra.mxu0 %v714_v15  ;;  %373 = vmatpush1.bf16.msra.mxu1 %v746_v28  ;;  %v769_v56 = vld [vmem:[%s925_s3 + $0x20] sm:$0xff]   ;;  %v771_v1 = vld [vmem:[%s925_s3 + $0x18] sm:$0xff]   ;;  %v772_v2 = vld [vmem:[%s925_s3 + $0x50] sm:$0xff]   ;;  %v93_v13 = vshrl.u32 %v92_v12, 7 }
  0x23   :  { %331 = vmatprep.subr.bf16.mxu0 %v715_v18  ;;  %374 = vmatprep.subr.bf16.mxu1 %v749_v29  ;;  %v759_v60 = vld [vmem:[#allocation3 + $0x84] ss:$8 sps:$4 sm:$0xff]   ;;  %v761_v61 = vld [vmem:[#allocation3 + $0x80] ss:$8 sps:$4 sm:$0xff]   ;;  %v654_v32 = vld [vmem:[%s926_s4] ss:$0 sm:$0xff] }
  0x24   :  { %v43_v62 = vld [vmem:[%s922_s0] sm:$0xff]  ;;  %v773_v3 = vld [vmem:[%s925_s3 + $0x10] sm:$0xff]   ;;  %v775_v5 = vld [vmem:[%s925_s3 + $0x8] sm:$0xff]   ;;  %v94_v14 = vsub.s32 0, %v93_v13  ;;  %v98_v16 = vsub.s32 1, %v93_v13 }
  0x25   :  { %v46_v63 = vpack.c.bf16 %v43_v62, %v43_v62  ;;  %v776_v6 = vld [vmem:[%s925_s3 + $0x40] sm:$0xff]  }
  0x26   :  { %332 = vmatpush1.bf16.msra.mxu0 %v717_v22  ;;  %375 = vmatpush1.bf16.msra.mxu1 %v752_v33  ;;  %v777_v7 = vld [vmem:[%s925_s3] sm:$0xff]  }
  0x27   :  { %333 = vmatprep.subr.bf16.mxu0 %v718_v23  ;;  %376 = vmatprep.subr.bf16.mxu1 %v755_v36  ;;  %v90_v15 = vld [vmem:[%s924_s2] sm:$0x3] }
  0x28   :  { %v95_v17 = vrot.slane %v90_v15, %v94_v14  ;;  %v99_v18 = vrot.slane %v90_v15, %v98_v16 }
  0x2a   :  { %334 = vmatpush1.bf16.msra.mxu0 %v720_v26  ;;  %377 = vmatpush1.bf16.msra.mxu1 %v758_v38  ;;  %v671_v38 = vld [vmem:[%s927_s5] ss:$0 sm:$0xff] }
  0x2b   :  { %335 = vmatprep.subr.bf16.mxu0 %v721_v27  ;;  %673 = vmatprep.subr.bf16.mxu1 %v762_v41 }
  0x2d   :  { %653 = vmatmul.mubr.msk.bf16.vlgmr.msra.gmra.mxu1 %vm307_vm2, %v48_v44 }
  0x2e   :  { %336 = vmatpush1.bf16.msra.mxu0 %v723_v30  ;;  %674 = vmatpush3.bf16.msra.mxu1 %v763_v43 }
  0x2f   :  { %337 = vmatprep.subr.bf16.mxu0 %v724_v31  ;;  %675 = vmatprep.subr.bf16.mxu1 %v764_v45 }
  0x32   :  { %338 = vmatpush2.bf16.msra.mxu0 %v726_v35  ;;  %676 = vmatpush3.bf16.msra.mxu1 %v765_v48 }
  0x33   :  { %339 = vmatprep.subr.bf16.mxu0 %v727_v37  ;;  %677 = vmatprep.subr.bf16.mxu1 %v766_v49 }
  0x36   :  { %340 = vmatpush2.bf16.msra.mxu0 %v729_v40  ;;  %678 = vmatpush3.bf16.msra.mxu1 %v767_v52 }
  0x37   :  { %341 = vmatprep.subr.bf16.mxu0 %v730_v42  ;;  %679 = vmatprep.subr.bf16.mxu1 %v768_v53  ;;  %v672_v42 = vld [vmem:[#allocation2] ss:$0 sm:$0xff] }
  0x3a   :  { %342 = vmatpush2.bf16.msra.mxu0 %v733_v46  ;;  %680 = vmatpush3.bf16.msra.mxu1 %v769_v56 }
  0x3b   :  { %343 = vmatprep.subr.bf16.mxu0 %v735_v47  ;;  %681 = vmatprep.subr.bf16.mxu1 %v770_v0 }
  0x3e   :  { %344 = vmatpush2.bf16.msra.mxu0 %v739_v50  ;;  %682 = vmatpush3.bf16.msra.mxu1 %v771_v1 }
  0x3f   :  { %345 = vmatprep.subr.bf16.mxu0 %v741_v51  ;;  %683 = vmatprep.subr.bf16.mxu1 %v772_v2 }
  0x42   :  { %346 = vmatpush2.bf16.msra.mxu0 %v745_v54  ;;  %684 = vmatpush3.bf16.msra.mxu1 %v773_v3 }
  0x43   :  { %347 = vmatprep.subr.bf16.mxu0 %v747_v55  ;;  %685 = vmatprep.subr.bf16.mxu1 %v774_v4 }
  0x46   :  { %348 = vmatpush2.bf16.msra.mxu0 %v751_v57  ;;  %686 = vmatpush3.bf16.msra.mxu1 %v775_v5 }
  0x47   :  { %349 = vmatprep.subr.bf16.mxu0 %v753_v58  ;;  %687 = vmatprep.subr.bf16.mxu1 %v776_v6 }
  0x4a   :  { %350 = vmatpush2.bf16.msra.mxu0 %v757_v59  ;;  %688 = vmatpush3.bf16.msra.mxu1 %v777_v7 }
  0x4b   :  { %351 = vmatprep.subr.bf16.mxu0 %v759_v60 }
  0x4e   :  { %352 = vmatpush2.bf16.msra.mxu0 %v761_v61 }
  0x51   :  { %354 = vmatmul.mubr.bf16.vlgmr.msra.gmra.mxu0 %v46_v63 }
  0xed   :  { %v396_v8 = vpop.f32.mrf.mxu1 }
  0xef   :  { %v398_v9 = vpop.f32.mrf.mxu1 }
  0xf1   :  { %v400_v10 = vpop.f32.mrf.mxu1 }
  0xf3   :  { %v401_v11 = vpop.f32.mrf.mxu1 }
 0x111   :  { %v355_v19 = vpop.f32.mrf.mxu0 }
 0x112   :  { %v356_v20 = vadd.f32 %v355_v19, %v95_v17 }
 0x113   :  { %v357_v21 = vpop.f32.mrf.mxu0 }
 0x114   :  { %v397_v22 = vadd.f32 %v396_v8, %v356_v20  ;;  %v358_v23 = vadd.f32 %v357_v21, %v99_v18 }
 0x115   :  { %v359_v24 = vpop.f32.mrf.mxu0 }
 0x116   :  { %v399_v25 = vadd.f32 %v398_v9, %v358_v23  ;;  %v403_v26 = vmax.f32 %v397_v22, 0.0 }
 0x117   :  { %v360_v27 = vpop.f32.mrf.mxu0 }
 0x118   :  { %v404_v28 = vmax.f32 %v399_v25, 0.0  ;;  %v405_v30 = vpack.c.bf16 %v403_v26, %v403_v26 }
 0x11a   :  { %v406_v29 = vpack.c.bf16 %v404_v28, %v404_v28 }
 0x11c   :  { %574 = vmatprep.mubr.bf16.mxu1 %v406_v29 }
 0x11d   :  { %575 = vmatmul.mubr.bf16.vlgmr.msra.gmra.mxu1 %v405_v30 }
 0x1dd   :  { %v689_v31 = vpop.f32.mrf.mxu1 }
 0x1df   :  { %v690_v33 = vpop.f32.mrf.mxu1 }
 0x1e0   :  { %v691_v34 = vadd.f32 %v690_v33, %v689_v31 }
 0x1e1   :  { %v692_v35 = vpop.f32.mrf.mxu1 }
 0x1e2   :  { %v577_v36 = vadd.f32 %v691_v34, %v654_v32 }
 0x1e3   :  { %v693_v37 = vpop.f32.mrf.mxu1 }
 0x1e4   :  { %v582_v39 = vmax.f32 %v577_v36, 0.0 }
 0x1e6   :  { %v590_v40 = vmul.f32 %v671_v38, %v582_v39 }
 0x1e8   :  { %v592_v41 = vsel %vm591_vm3, %v590_v40, 0.0 }
 0x1e9   :  { %593 = vadd.xlane.f32.xlu0 %v592_v41 }
 0x272   :  { %v594_v43 = vpop.xlane.xlu0 %593 }
 0x273   :  { %v602_v44 = vadd.f32 %v672_v42, %v594_v43 }
 0x275   :  { %778 = vtanh.f32 %v602_v44 }
 0x282   :  { %v779_v45 = vpop.eup %778 }
 0x283   :  { %605 = vst.msk [vmem:[%s929_s7] sm:$0xff] %vm604_vm4, %v779_v45 }
 0x284   :  { %610 = vsyncpa [#allocation4], 1 }

</bundles_post_ra>
